<compile_context>
chip_gen: v7x
topology: tpu7x:2x2x1
jax: 0.10.0
libtpu: 0.0.40
codegen_flags: <defaults>
</compile_context>

<pallas_src>
import functools
import math

import jax
import jax.numpy as jnp
from jax.experimental import pallas as pl
from jax.experimental.pallas import tpu as pltpu

BN_EPS = 1e-5


def _round_up(x, m):
    return (x + m - 1) // m * m


def _default_vmem_limit():
    # Per-generation VMEM budget: ~60% of physical VMEM, capped.
    try:
        cap = int(getattr(pltpu.get_tpu_info(), "vmem_capacity_bytes", 0) or 0)
    except Exception:
        cap = 0
    if cap <= 0:
        cap = 64 * 1024 * 1024
    return int(min((cap * 3) // 5, 100 * 1024 * 1024))


VMEM_LIMIT_BYTES = _default_vmem_limit()


# ----------------------------------------------------------------------------
# Pallas kernels
# ----------------------------------------------------------------------------
def _fused_mm_kernel(x_ref, w_ref, scale_ref, bias_ref, o_ref, *, apply_relu):
    """out = [relu]((x @ w) * scale + bias); bf16 MXU matmul, f32 accumulate."""
    acc = jnp.dot(x_ref[...], w_ref[...], preferred_element_type=jnp.float32)
    out = acc * scale_ref[...] + bias_ref[...]
    if apply_relu:
        out = jnp.maximum(out, 0.0)
    o_ref[...] = out.astype(o_ref.dtype)


def _direct_conv_kernel(x_ref, w_ref, scale_ref, bias_ref, *rest,
                        offs, apply_relu, has_residual):
    """Stride-1 conv on the flattened, zero-padded activation (no im2col).

    x_ref : (1, Hp*Wp + kw-1, Cin) bf16  padded + flattened (+ guard rows)
    w_ref : (kh*kw, Cin, Cout)     bf16  whole weight, resident across grid
    o_ref : (1, Ho*Wp, Cout)             output over the padded-width grid;
                                         columns [Wo, Wp) are junk, sliced off
                                         by the wrapper.
    The contribution of window position q (static flat offset offs[q]) to
    output row m is x[m + offs[q]] @ w[q]; the window loop is unrolled over
    static contiguous slices, so no 9x patch tensor ever touches HBM.
    """
    if has_residual:
        res_ref, o_ref = rest
    else:
        (o_ref,) = rest
    n_out = o_ref.shape[1]
    acc = None
    for q, off in enumerate(offs):
        contrib = jnp.dot(x_ref[0, off:off + n_out, :], w_ref[q],
                          preferred_element_type=jnp.float32)
        acc = contrib if acc is None else acc + contrib
    out = acc * scale_ref[...] + bias_ref[...]
    if has_residual:
        out = out + res_ref[0].astype(jnp.float32)
    if apply_relu:
        out = jnp.maximum(out, 0.0)
    o_ref[0] = out.astype(o_ref.dtype)


def _avgpool_kernel(p_ref, o_ref, *, inv_hw):
    """p: (B, HW, C) -> mean over the spatial axis (f32 accumulate)."""
    o_ref[...] = jnp.sum(p_ref[...].astype(jnp.float32), axis=1) * inv_hw


# ----------------------------------------------------------------------------
# Pallas-call wrappers
# ----------------------------------------------------------------------------
def fused_matmul(x, w, scale, bias, apply_relu=False, out_dtype=jnp.bfloat16):
    """(M,K)bf16 @ (K,N)bf16 * scale + bias (+relu) -> (M,N) out_dtype.

    tn = N (<=512 for every ResNet-18 layer): the weight block index is
    constant so the (K, N) tile is DMA'd once and held; output stores are
    lane-dense.  tm adapts to K (~4 MiB bf16 LHS tile) so small-K layers use
    large blocks and few grid steps.  Edge tiles use partial-block masking.
    """
    M, K = x.shape
    Kw, N = w.shape
    assert K == Kw, (K, Kw)
    tgt = (4 << 20) // max(2 * K, 1)
    tm = max(128, min(2048, (tgt // 128) * 128))
    tm = M if M <= tm else tm

    flops = 2 * M * N * K
    bytes_accessed = int(2 * M * K + 2 * K * N + 8 * N +
                         M * N * jnp.dtype(out_dtype).itemsize)
    return pl.pallas_call(
        functools.partial(_fused_mm_kernel, apply_relu=apply_relu),
        out_shape=jax.ShapeDtypeStruct((M, N), out_dtype),
        grid=(pl.cdiv(M, tm),),
        in_specs=[
            pl.BlockSpec((tm, K), lambda i: (i, 0)),
            pl.BlockSpec((K, N), lambda i: (0, 0)),
            pl.BlockSpec((1, N), lambda i: (0, 0)),
            pl.BlockSpec((1, N), lambda i: (0, 0)),
        ],
        out_specs=pl.BlockSpec((tm, N), lambda i: (i, 0)),
        compiler_params=pltpu.CompilerParams(
            dimension_semantics=("parallel",),
            vmem_limit_bytes=VMEM_LIMIT_BYTES),
        cost_estimate=pl.CostEstimate(flops=flops, transcendentals=0,
                                      bytes_accessed=bytes_accessed),
    )(x, w, scale, bias)


def conv_bn_direct(x, conv, apply_relu, residual=None):
    """Stride-1 'same' conv + folded BN (+residual) (+ReLU), one Pallas call."""
    kh, kw = conv["kh"], conv["kw"]
    pad = (kh - 1) // 2
    B, H, W, cin = x.shape
    cout = conv["w_dir"].shape[-1]
    Hp, Wp = H + 2 * pad, W + 2 * pad
    Ho, Wo = Hp - kh + 1, Wp - kw + 1
    n_out = Ho * Wp                       # padded-width output grid
    n_in = Hp * Wp + (kw - 1)             # guard rows for the largest shift
    offs = tuple(di * Wp + dj for di in range(kh) for dj in range(kw))

    xb = jnp.pad(x.astype(jnp.bfloat16),
                 ((0, 0), (pad, pad), (pad, pad), (0, 0)))
    xf = jnp.pad(xb.reshape(B, Hp * Wp, cin), ((0, 0), (0, kw - 1), (0, 0)))

    has_res = residual is not None
    args = [xf, conv["w_dir"], conv["scale"], conv["bias"]]
    in_specs = [
        pl.BlockSpec((1, n_in, cin), lambda b: (b, 0, 0)),
        pl.BlockSpec((kh * kw, cin, cout), lambda b: (0, 0, 0)),
        pl.BlockSpec((1, cout), lambda b: (0, 0)),
        pl.BlockSpec((1, cout), lambda b: (0, 0)),
    ]
    res_bytes = 0
    if has_res:
        rp = jnp.pad(residual.astype(jnp.bfloat16),
                     ((0, 0), (0, 0), (0, Wp - Wo), (0, 0)))
        rp = rp.reshape(B, n_out, cout)
        args.append(rp)
        in_specs.append(pl.BlockSpec((1, n_out, cout), lambda b: (b, 0, 0)))
        res_bytes = rp.size * 2

    flops = 2 * B * n_out * cin * cout * kh * kw
    bytes_accessed = int(xf.size * 2 + conv["w_dir"].size * 2 +
                         B * n_out * cout * 2 + res_bytes + 8 * cout)
    out = pl.pallas_call(
        functools.partial(_direct_conv_kernel, offs=offs,
                          apply_relu=apply_relu, has_residual=has_res),
        out_shape=jax.ShapeDtypeStruct((B, n_out, cout), jnp.bfloat16),
        grid=(B,),
        in_specs=in_specs,
        out_specs=pl.BlockSpec((1, n_out, cout), lambda b: (b, 0, 0)),
        compiler_params=pltpu.CompilerParams(
            dimension_semantics=("parallel",),
            vmem_limit_bytes=VMEM_LIMIT_BYTES),
        cost_estimate=pl.CostEstimate(flops=flops, transcendentals=0,
                                      bytes_accessed=bytes_accessed),
    )(*args)
    # Drop the kw-1 junk columns produced by the padded-width output grid.
    return out.reshape(B, Ho, Wp, cout)[:, :, :Wo, :]


def _im2col(xb, kh, kw, stride, pad, k_pad=0):
    """NHWC bf16 -> (B, Ho, Wo, kh*kw*C [+ k_pad]) patches (strided convs only)."""
    B, H, W, C = xb.shape
    xp = jnp.pad(xb, ((0, 0), (pad, pad), (pad, pad), (0, 0)))
    Ho = (H + 2 * pad - kh) // stride + 1
    Wo = (W + 2 * pad - kw) // stride + 1
    slabs = [xp[:, di:di + stride * Ho:stride, dj:dj + stride * Wo:stride, :]
             for di in range(kh) for dj in range(kw)]
    if k_pad:
        slabs.append(jnp.zeros((B, Ho, Wo, k_pad), xb.dtype))
    patches = slabs[0] if len(slabs) == 1 else jnp.concatenate(slabs, axis=-1)
    return patches, Ho, Wo


def conv_bn_im2col(x, conv, stride, pad, apply_relu):
    """Strided conv (stem / downsample / first conv of layers 2-4) via im2col."""
    kh, kw = conv["kh"], conv["kw"]
    B, _, _, cin = x.shape
    kp, cout = conv["w_mat"].shape
    k_pad = kp - kh * kw * cin
    patches, Ho, Wo = _im2col(x.astype(jnp.bfloat16), kh, kw, stride, pad, k_pad)
    xm = patches.reshape(B * Ho * Wo, kp)
    out = fused_matmul(xm, conv["w_mat"], conv["scale"], conv["bias"],
                       apply_relu=apply_relu, out_dtype=jnp.bfloat16)
    return out.reshape(B, Ho, Wo, cout)


def conv_bn(x, conv, stride, pad, apply_relu, residual=None):
    if stride == 1 and conv["kh"] == 3 and pad == 1:
        return conv_bn_direct(x, conv, apply_relu, residual)
    assert residual is None
    return conv_bn_im2col(x, conv, stride, pad, apply_relu)


def maxpool2d(x, ksize, stride, pad):
    """Running max over the ksize^2 shifted strided views (XLA fuses to 1 pass).

    TODO(synk): stride-2 overlapping windows are not cleanly expressible as a
    BlockSpec without re-materializing patches, so this stays as fused XLA ops.
    """
    B, H, W, C = x.shape
    xp = jnp.pad(x, ((0, 0), (pad, pad), (pad, pad), (0, 0)),
                 constant_values=-jnp.inf)
    Ho = (H + 2 * pad - ksize) // stride + 1
    Wo = (W + 2 * pad - ksize) // stride + 1
    out = None
    for di in range(ksize):
        for dj in range(ksize):
            s = xp[:, di:di + stride * Ho:stride, dj:dj + stride * Wo:stride, :]
            out = s if out is None else jnp.maximum(out, s)
    return out


def global_avgpool(x):
    B, H, W, C = x.shape
    p = x.reshape(B, H * W, C)
    return pl.pallas_call(
        functools.partial(_avgpool_kernel, inv_hw=1.0 / (H * W)),
        out_shape=jax.ShapeDtypeStruct((B, C), jnp.float32),
        grid=(1,),
        in_specs=[pl.BlockSpec((B, H * W, C), lambda i: (0, 0, 0))],
        out_specs=pl.BlockSpec((B, C), lambda i: (0, 0)),
        compiler_params=pltpu.CompilerParams(
            vmem_limit_bytes=VMEM_LIMIT_BYTES),
    )(p)


# ----------------------------------------------------------------------------
# Parameter init (deterministic, mirrors the PyTorch __init__ shapes/init)
# ----------------------------------------------------------------------------
def _bn_fold(c):
    # gamma=1, beta=0, running_mean=0, running_var=1 -> folded scale/bias.
    scale = jnp.full((1, c), 1.0 / math.sqrt(1.0 + BN_EPS), jnp.float32)
    bias = jnp.zeros((1, c), jnp.float32)
    return scale, bias


def _conv_params(key, kh, kw, cin, cout):
    # kaiming_normal_(mode='fan_out', nonlinearity='relu')
    fan_out = kh * kw * cout
    std = math.sqrt(2.0 / fan_out)
    w = std * jax.random.normal(key, (kh, kw, cin, cout), jnp.float32)
    k = kh * kw * cin
    kp = _round_up(k, 8)                 # sublane-aligned only (full-K blocks)
    w_mat = jnp.zeros((kp, cout), jnp.float32).at[:k, :].set(
        w.reshape(k, cout)).astype(jnp.bfloat16)
    w_dir = w.reshape(kh * kw, cin, cout).astype(jnp.bfloat16)
    scale, bias = _bn_fold(cout)
    return {"w_mat": w_mat, "w_dir": w_dir, "kh": kh, "kw": kw,
            "scale": scale, "bias": bias}


def init_resnet18_params(key, num_classes=10):
    keys = iter(jax.random.split(key, 64))
    params = {"stem": _conv_params(next(keys), 7, 7, 3, 64)}

    layers_cfg = [(64, 2, 1), (128, 2, 2), (256, 2, 2), (512, 2, 2)]
    inplanes = 64
    layers = []
    for planes, nblocks, stride in layers_cfg:
        blocks = []
        for b in range(nblocks):
            s = stride if b == 0 else 1
            blk = {
                "stride": s,
                "conv1": _conv_params(next(keys), 3, 3, inplanes, planes),
                "conv2": _conv_params(next(keys), 3, 3, planes, planes),
            }
            if s != 1 or inplanes != planes:
                blk["down"] = _conv_params(next(keys), 1, 1, inplanes, planes)
            blocks.append(blk)
            inplanes = planes
        layers.append(blocks)
    params["layers"] = layers

    # nn.Linear(512, num_classes) default init: U(-1/sqrt(fan_in), 1/sqrt(fan_in)).
    bound = 1.0 / math.sqrt(512)
    params["fc_w"] = jax.random.uniform(
        next(keys), (512, num_classes), jnp.float32, -bound, bound
    ).astype(jnp.bfloat16)
    params["fc_b"] = jax.random.uniform(next(keys), (1, num_classes),
                                        jnp.float32, -bound, bound)
    params["fc_scale"] = jnp.ones((1, num_classes), jnp.float32)
    return params


# ----------------------------------------------------------------------------
# Forward pass
# ----------------------------------------------------------------------------
def basic_block(x, blk):
    identity = x
    out = conv_bn(x, blk["conv1"], stride=blk["stride"], pad=1, apply_relu=True)
    if "down" in blk:
        identity = conv_bn(x, blk["down"], stride=blk["stride"], pad=0,
                           apply_relu=False)
    # conv2 -> bn2 -> (+identity) -> relu fused in one Pallas call.
    out = conv_bn(out, blk["conv2"], stride=1, pad=1, apply_relu=True,
                  residual=identity)
    return out


def resnet18_forward(x_nchw, params):
    # NCHW (PyTorch convention) -> internal NHWC.
    x = jnp.transpose(x_nchw, (0, 2, 3, 1)).astype(jnp.float32)
    x = conv_bn(x, params["stem"], stride=2, pad=3, apply_relu=True)
    x = maxpool2d(x, 3, 2, 1)
    for blocks in params["layers"]:
        for blk in blocks:
            x = basic_block(x, blk)
    # TODO(synk): the reference default fc_spatial_size=3 produces 512*9
    # features, incompatible with nn.Linear(512, num_classes); we use global
    # average pooling (fc_spatial_size=1) so the fc shapes are consistent.
    x = global_avgpool(x)                                    # (B, 512) f32
    logits = fused_matmul(x.astype(jnp.bfloat16), params["fc_w"],
                          params["fc_scale"], params["fc_b"],
                          apply_relu=False, out_dtype=jnp.float32)
    return logits


if __name__ == "__main__":
    key = jax.random.PRNGKey(0)
    k_param, k_x = jax.random.split(key)
    params = init_resnet18_params(k_param, num_classes=10)
    x = jax.random.normal(k_x, (2, 3, 16, 16), jnp.float32)  # NCHW like PyTorch
    out = resnet18_forward(x, params)
    out = jax.block_until_ready(out)
    assert out.shape == (2, 10)
    assert bool(jnp.all(jnp.isfinite(out)))
    print("KERNEL_OK")
</pallas_src>

<mosaic_0001>
module attributes {stable_mosaic.version = 11 : i64} {
  func.func @_fused_mm_kernel(%arg0: i32, %arg1: memref<128x152xbf16, #tpu.memory_space<vmem>>, %arg2: memref<152x64xbf16, #tpu.memory_space<vmem>>, %arg3: memref<1x64xf32, #tpu.memory_space<vmem>>, %arg4: memref<1x64xf32, #tpu.memory_space<vmem>>, %arg5: memref<128x64xbf16, #tpu.memory_space<vmem>>) attributes {dimension_semantics = [#tpu.dimension_semantics<parallel>], iteration_bounds = array<i64: 1>, scalar_prefetch = 0 : i64, scratch_operands = 0 : i64, tpu.core_type = #tpu.core_type<tc>, window_params = [{transform_indices = @transform_0, window_bounds = array<i64: 128, 152>}, {pipeline_mode = #tpu.pipeline_mode<synchronous>, transform_indices = @transform_1, window_bounds = array<i64: 152, 64>}, {pipeline_mode = #tpu.pipeline_mode<synchronous>, transform_indices = @transform_2, window_bounds = array<i64: 1, 64>}, {pipeline_mode = #tpu.pipeline_mode<synchronous>, transform_indices = @transform_3, window_bounds = array<i64: 1, 64>}, {transform_indices = @transform_4, window_bounds = array<i64: 128, 64>}]} {
    %c0 = arith.constant 0 : index
    %c0_0 = arith.constant 0 : index
    %0 = vector.load %arg1[%c0, %c0_0] : memref<128x152xbf16, #tpu.memory_space<vmem>>, vector<128x152xbf16>
    %c0_1 = arith.constant 0 : index
    %c0_2 = arith.constant 0 : index
    %1 = vector.load %arg2[%c0_1, %c0_2] : memref<152x64xbf16, #tpu.memory_space<vmem>>, vector<152x64xbf16>
    %cst = arith.constant dense<0.000000e+00> : vector<128x64xf32>
    %2 = tpu.matmul %0, %1, %cst {dimension_numbers = #tpu.dot_dimension_numbers<[1], [0], [0], [1], [0, 0, 1, 1], [], []>} : vector<128x152xbf16>, vector<152x64xbf16>, vector<128x64xf32> -> vector<128x64xf32>
    %c0_3 = arith.constant 0 : index
    %c0_4 = arith.constant 0 : index
    %3 = vector.load %arg3[%c0_3, %c0_4] : memref<1x64xf32, #tpu.memory_space<vmem>>, vector<1x64xf32>
    %4 = vector.broadcast %3 : vector<1x64xf32> to vector<128x64xf32>
    %5 = arith.mulf %2, %4 : vector<128x64xf32>
    %c0_5 = arith.constant 0 : index
    %c0_6 = arith.constant 0 : index
    %6 = vector.load %arg4[%c0_5, %c0_6] : memref<1x64xf32, #tpu.memory_space<vmem>>, vector<1x64xf32>
    %7 = vector.broadcast %6 : vector<1x64xf32> to vector<128x64xf32>
    %8 = arith.addf %5, %7 : vector<128x64xf32>
    %cst_7 = arith.constant 0.000000e+00 : f32
    %9 = vector.broadcast %cst_7 : f32 to vector<128x64xf32>
    %10 = arith.maximumf %8, %9 : vector<128x64xf32>
    %11 = arith.truncf %10 : vector<128x64xf32> to vector<128x64xbf16>
    %c0_8 = arith.constant 0 : index
    %c0_9 = arith.constant 0 : index
    %12 = vector.load %arg5[%c0_8, %c0_9] : memref<128x64xbf16, #tpu.memory_space<vmem>>, vector<128x64xbf16>
    tpu.vector_store %arg5[%c0_8, %c0_9], %11 {strides = array<i32>} : memref<128x64xbf16, #tpu.memory_space<vmem>>, vector<128x64xbf16>,
    return
  }
  func.func @transform_0(%arg0: i32) -> (i32, i32) {
    %c0_i32 = arith.constant 0 : i32
    %c0_i32_0 = arith.constant 0 : i32
    return %arg0, %c0_i32 : i32, i32
  }
  func.func @transform_1(%arg0: i32) -> (i32, i32) {
    %c0_i32 = arith.constant 0 : i32
    %c0_i32_0 = arith.constant 0 : i32
    %c0_i32_1 = arith.constant 0 : i32
    return %c0_i32, %c0_i32_0 : i32, i32
  }
  func.func @transform_2(%arg0: i32) -> (i32, i32) {
    %c0_i32 = arith.constant 0 : i32
    %c0_i32_0 = arith.constant 0 : i32
    %c0_i32_1 = arith.constant 0 : i32
    return %c0_i32, %c0_i32_0 : i32, i32
  }
  func.func @transform_3(%arg0: i32) -> (i32, i32) {
    %c0_i32 = arith.constant 0 : i32
    %c0_i32_0 = arith.constant 0 : i32
    %c0_i32_1 = arith.constant 0 : i32
    return %c0_i32, %c0_i32_0 : i32, i32
  }
  func.func @transform_4(%arg0: i32) -> (i32, i32) {
    %c0_i32 = arith.constant 0 : i32
    %c0_i32_0 = arith.constant 0 : i32
    return %arg0, %c0_i32 : i32, i32
  }
}

</mosaic_0001>

<bundles_post_ra>
// kernel: tpu_custom_call.1
= control target key start
LH: loop header
LB: loop body
LE: loop exit
PB: predicated region body
PF: predicated region fallthrough
CT: control target
= control target key end

     0   :  { %v578_v0 = vmov 0   ;;  %vm182_vm0 = vcmask 195584   ;;  %vm207_vm1 = vcmask 1043456   ;;  %vm434_vm2 = vcmask 519168   ;;  %s796_s1 = inlined_call_operand.vmem [shape: bf16[152,64], index: 1, kind: input, shape index: {}]   ;;  %s797_s0 = inlined_call_operand.vmem [shape: bf16[128,152], index: 0, kind: input, shape index: {}]   ;;  %s798_s2 = inlined_call_operand.vmem [shape: f32[1,64], index: 2, kind: input, shape index: {}]   ;;  %s799_s3 = inlined_call_operand.vmem [shape: f32[1,64], index: 3, kind: input, shape index: {}]   ;;  %s800_s4 = inlined_call_operand.vmem [shape: bf16[128,64], index: 4, kind: output, shape index: {}]  }
   0x1   :  { %211 = vmatprep.subr.bf16.mxu0 %v578_v0  ;;  %523 = vmatprep.subr.bf16.mxu1 %v578_v0  ;;  %v544_v1 = vld [vmem:[%s796_s1] sm:$0xff]   ;;  %v545_v2 = vld [vmem:[%s796_s1 + $0x8] sm:$0xff]   ;;  %v546_v3 = vld [vmem:[%s796_s1 + $0x10] sm:$0xff]  }
   0x2   :  { %212 = vmatpush1.bf16.msra.mxu0 %v544_v1  ;;  %533 = vmatpush1.bf16.msra.mxu1 %v544_v1  ;;  %v547_v4 = vld [vmem:[%s796_s1 + $0x18] sm:$0xff]   ;;  %v556_v5 = vld [vmem:[%s797_s0 + $0x4] ss:$8 sps:$4 sm:$0xff]   ;;  %v550_v9 = vld [vmem:[%s796_s1 + $0x30] sm:$0xff]  }
   0x3   :  { %213 = vmatprep.subr.bf16.mxu0 %v578_v0  ;;  %524 = vmatprep.subr.bf16.mxu1 %v578_v0  ;;  %v559_v6 = vld [vmem:[%s797_s0 + $0x44] ss:$8 sps:$4 sm:$0xff]   ;;  %v551_v10 = vld [vmem:[%s796_s1 + $0x38] sm:$0xff]   ;;  %v553_v12 = vld [vmem:[%s796_s1 + $0x48] ss:$0 sps:$4 sm:$0xff]  }
   0x4   :  { %481 = vmatprep.mubr.msk.bf16.mxu0 %vm182_vm0, %v556_v5  ;;  %v548_v7 = vld [vmem:[%s796_s1 + $0x20] sm:$0xff]   ;;  %485 = vmatprep.mubr.msk.bf16.mxu1 %vm182_vm0, %v559_v6  ;;  %v549_v8 = vld [vmem:[%s796_s1 + $0x28] sm:$0xff]   ;;  %v209_v13 = vsel %vm207_vm1, %v553_v12, 0  ;;  %v560_v16 = vld [vmem:[%s797_s0 + $0x14] ss:$8 sps:$4 sm:$0xff]  }
   0x5   :  { %v552_v11 = vld [vmem:[%s796_s1 + $0x40] sm:$0xff]   ;;  %v562_v17 = vld [vmem:[%s797_s0 + $0x54] ss:$8 sps:$4 sm:$0xff]   ;;  %v564_v18 = vld [vmem:[%s797_s0 + $0x10] ss:$8 sps:$4 sm:$0xff]  }
   0x6   :  { %214 = vmatpush1.bf16.msra.mxu0 %v545_v2  ;;  %534 = vmatpush1.bf16.msra.mxu1 %v545_v2  ;;  %v554_v14 = vld [vmem:[%s797_s0] ss:$8 sps:$4 sm:$0xff]   ;;  %v565_v19 = vld [vmem:[%s797_s0 + $0x50] ss:$8 sps:$4 sm:$0xff]   ;;  %v566_v20 = vld [vmem:[%s797_s0 + $0x24] ss:$8 sps:$4 sm:$0xff]  }
   0x7   :  { %215 = vmatprep.subr.bf16.mxu0 %v578_v0  ;;  %525 = vmatprep.subr.bf16.mxu1 %v578_v0  ;;  %v557_v15 = vld [vmem:[%s797_s0 + $0x40] ss:$8 sps:$4 sm:$0xff]   ;;  %v568_v21 = vld [vmem:[%s797_s0 + $0x64] ss:$8 sps:$4 sm:$0xff]   ;;  %v572_v24 = vld [vmem:[%s797_s0 + $0x34] ss:$8 sps:$4 sm:$0xff]  }
   0x8   :  { %v570_v22 = vld [vmem:[%s797_s0 + $0x20] ss:$8 sps:$4 sm:$0xff]   ;;  %v574_v25 = vld [vmem:[%s797_s0 + $0x74] ss:$8 sps:$4 sm:$0xff]   ;;  %v576_v26 = vld [vmem:[%s797_s0 + $0x30] ss:$8 sps:$4 sm:$0xff]  }
   0x9   :  { %v571_v23 = vld [vmem:[%s797_s0 + $0x60] ss:$8 sps:$4 sm:$0xff]   ;;  %v577_v27 = vld [vmem:[%s797_s0 + $0x70] ss:$8 sps:$4 sm:$0xff]  }
   0xa   :  { %216 = vmatpush1.bf16.msra.mxu0 %v546_v3  ;;  %535 = vmatpush1.bf16.msra.mxu1 %v546_v3  ;;  %v693_v28 = vld [vmem:[%s798_s2] ss:$0 sm:$0xff] }
   0xb   :  { %217 = vmatprep.subr.bf16.mxu0 %v578_v0  ;;  %526 = vmatprep.subr.bf16.mxu1 %v578_v0  ;;  %v698_v30 = vld [vmem:[%s799_s3] ss:$0 sm:$0xff] }
   0xe   :  { %218 = vmatpush1.bf16.msra.mxu0 %v547_v4  ;;  %536 = vmatpush1.bf16.msra.mxu1 %v547_v4 }
   0xf   :  { %219 = vmatprep.subr.bf16.mxu0 %v578_v0  ;;  %527 = vmatprep.subr.bf16.mxu1 %v578_v0 }
  0x12   :  { %220 = vmatpush1.bf16.msra.mxu0 %v548_v7  ;;  %537 = vmatpush1.bf16.msra.mxu1 %v548_v7 }
  0x13   :  { %221 = vmatprep.subr.bf16.mxu0 %v578_v0  ;;  %528 = vmatprep.subr.bf16.mxu1 %v578_v0 }
  0x16   :  { %222 = vmatpush1.bf16.msra.mxu0 %v549_v8  ;;  %538 = vmatpush1.bf16.msra.mxu1 %v549_v8 }
  0x17   :  { %223 = vmatprep.subr.bf16.mxu0 %v578_v0  ;;  %529 = vmatprep.subr.bf16.mxu1 %v578_v0 }
  0x1a   :  { %224 = vmatpush1.bf16.msra.mxu0 %v550_v9  ;;  %539 = vmatpush1.bf16.msra.mxu1 %v550_v9 }
  0x1b   :  { %225 = vmatprep.subr.bf16.mxu0 %v578_v0  ;;  %530 = vmatprep.subr.bf16.mxu1 %v578_v0 }
  0x1e   :  { %226 = vmatpush1.bf16.msra.mxu0 %v551_v10  ;;  %540 = vmatpush1.bf16.msra.mxu1 %v551_v10 }
  0x1f   :  { %227 = vmatprep.subr.bf16.mxu0 %v578_v0  ;;  %531 = vmatprep.subr.bf16.mxu1 %v578_v0 }
  0x22   :  { %228 = vmatpush1.bf16.msra.mxu0 %v552_v11  ;;  %541 = vmatpush1.bf16.msra.mxu1 %v552_v11 }
  0x23   :  { %229 = vmatprep.subr.bf16.mxu0 %v578_v0  ;;  %532 = vmatprep.subr.bf16.mxu1 %v578_v0 }
  0x26   :  { %230 = vmatpush1.bf16.msra.mxu0 %v209_v13  ;;  %542 = vmatpush1.bf16.msra.mxu1 %v209_v13 }
  0x29   :  { %244 = vmatmul.mubr.bf16.vlgmr.msra.gmra.mrb[0].mxu0 %v554_v14  ;;  %276 = vmatmul.mubr.bf16.vlgmr.msra.gmra.mrb[0].mxu1 %v557_v15 }
  0x2a   :  { %482 = vmatprep.mubr.msk.bf16.mxu0 %vm182_vm0, %v560_v16  ;;  %486 = vmatprep.mubr.msk.bf16.mxu1 %vm182_vm0, %v562_v17 }
  0x31   :  { %252 = vmatmul.mubr.bf16.gmra.mrb[4].mxu0 %v564_v18  ;;  %284 = vmatmul.mubr.bf16.gmra.mrb[4].mxu1 %v565_v19 }
  0x32   :  { %483 = vmatprep.mubr.msk.bf16.mxu0 %vm182_vm0, %v566_v20  ;;  %487 = vmatprep.mubr.msk.bf16.mxu1 %vm182_vm0, %v568_v21 }
  0x39   :  { %260 = vmatmul.mubr.bf16.gmra.mrb[8].mxu0 %v570_v22  ;;  %292 = vmatmul.mubr.bf16.gmra.mrb[8].mxu1 %v571_v23 }
  0x3a   :  { %484 = vmatprep.mubr.msk.bf16.mxu0 %vm182_vm0, %v572_v24  ;;  %488 = vmatprep.mubr.msk.bf16.mxu1 %vm182_vm0, %v574_v25 }
  0x41   :  { %268 = vmatmul.mubr.bf16.gmra.mrb[12].mxu0 %v576_v26  ;;  %300 = vmatmul.mubr.bf16.gmra.mrb[12].mxu1 %v577_v27 }
  0xfc   :  { %v245_v29 = vpop.f32.mrb[0].mxu0  ;;  %v277_v31 = vpop.f32.mrb[0].mxu1 }
  0xfd   :  { %v315_v32 = vmul.f32 %v693_v28, %v245_v29  ;;  %v323_v33 = vmul.f32 %v693_v28, %v277_v31  ;;  %v247_v34 = vpop.f32.mrb[1].mxu0  ;;  %v279_v35 = vpop.f32.mrb[1].mxu1 }
  0xfe   :  { %v248_v36 = vpop.f32.mrb[2].mxu0  ;;  %v280_v37 = vpop.f32.mrb[2].mxu1 }
  0xff   :  { %v338_v38 = vadd.f32 %v698_v30, %v315_v32  ;;  %v346_v39 = vadd.f32 %v698_v30, %v323_v33  ;;  %v316_v40 = vmul.f32 %v693_v28, %v248_v36  ;;  %v324_v41 = vmul.f32 %v693_v28, %v280_v37  ;;  %v250_v42 = vpop.f32.mrb[3].mxu0  ;;  %v282_v43 = vpop.f32.mrb[3].mxu1 }
 0x101   :  { %v354_v44 = vmax.f32 %v338_v38, 0.0  ;;  %v362_v45 = vmax.f32 %v346_v39, 0.0  ;;  %v339_v46 = vadd.f32 %v698_v30, %v316_v40  ;;  %v347_v47 = vadd.f32 %v698_v30, %v324_v41 }
 0x103   :  { %v507_v48 = vpack.c.bf16 %v354_v44, %v354_v44  ;;  %v515_v49 = vpack.c.bf16 %v362_v45, %v362_v45  ;;  %v355_v50 = vmax.f32 %v339_v46, 0.0  ;;  %v363_v51 = vmax.f32 %v347_v47, 0.0 }
 0x104   :  { %v253_v52 = vpop.f32.mrb[4].mxu0  ;;  %v285_v53 = vpop.f32.mrb[4].mxu1 }
 0x105   :  { %435 = vst.msk [vmem:[%s800_s4] sm:$0xf] %vm434_vm2, %v507_v48  ;;  %443 = vst.msk [vmem:[%s800_s4 + $0x20] sm:$0xf] %vm434_vm2, %v515_v49  ;;  %v508_v54 = vpack.c.bf16 %v355_v50, %v355_v50  ;;  %v516_v55 = vpack.c.bf16 %v363_v51, %v363_v51  ;;  %v317_v56 = vmul.f32 %v693_v28, %v253_v52  ;;  %v255_v58 = vpop.f32.mrb[5].mxu0  ;;  %v287_v59 = vpop.f32.mrb[5].mxu1 }
 0x106   :  { %v325_v57 = vmul.f32 %v693_v28, %v285_v53  ;;  %v256_v60 = vpop.f32.mrb[6].mxu0  ;;  %v288_v61 = vpop.f32.mrb[6].mxu1 }
 0x107   :  { %436 = vst.msk [vmem:[%s800_s4 + $0x4] sm:$0xf] %vm434_vm2, %v508_v54  ;;  %444 = vst.msk [vmem:[%s800_s4 + $0x24] sm:$0xf] %vm434_vm2, %v516_v55  ;;  %v340_v62 = vadd.f32 %v698_v30, %v317_v56  ;;  %v318_v0 = vmul.f32 %v693_v28, %v256_v60  ;;  %v326_v1 = vmul.f32 %v693_v28, %v288_v61  ;;  %v258_v2 = vpop.f32.mrb[7].mxu0  ;;  %v290_v3 = vpop.f32.mrb[7].mxu1 }
 0x108   :  { %v348_v63 = vadd.f32 %v698_v30, %v325_v57 }
 0x109   :  { %v356_v4 = vmax.f32 %v340_v62, 0.0  ;;  %v341_v6 = vadd.f32 %v698_v30, %v318_v0  ;;  %v349_v7 = vadd.f32 %v698_v30, %v326_v1 }
 0x10a   :  { %v364_v5 = vmax.f32 %v348_v63, 0.0 }
 0x10b   :  { %v509_v8 = vpack.c.bf16 %v356_v4, %v356_v4  ;;  %v357_v10 = vmax.f32 %v341_v6, 0.0  ;;  %v365_v11 = vmax.f32 %v349_v7, 0.0 }
 0x10c   :  { %v517_v9 = vpack.c.bf16 %v364_v5, %v364_v5  ;;  %v261_v12 = vpop.f32.mrb[8].mxu0  ;;  %v293_v13 = vpop.f32.mrb[8].mxu1 }
 0x10d   :  { %437 = vst.msk [vmem:[%s800_s4 + $0x8] sm:$0xf] %vm434_vm2, %v509_v8  ;;  %v510_v14 = vpack.c.bf16 %v357_v10, %v357_v10  ;;  %v518_v15 = vpack.c.bf16 %v365_v11, %v365_v11  ;;  %v319_v16 = vmul.f32 %v693_v28, %v261_v12  ;;  %v327_v17 = vmul.f32 %v693_v28, %v293_v13  ;;  %v263_v18 = vpop.f32.mrb[9].mxu0  ;;  %v295_v19 = vpop.f32.mrb[9].mxu1 }
 0x10e   :  { %445 = vst.msk [vmem:[%s800_s4 + $0x28] sm:$0xf] %vm434_vm2, %v517_v9  ;;  %v264_v20 = vpop.f32.mrb[10].mxu0  ;;  %v296_v21 = vpop.f32.mrb[10].mxu1 }
 0x10f   :  { %438 = vst.msk [vmem:[%s800_s4 + $0xc] sm:$0xf] %vm434_vm2, %v510_v14  ;;  %446 = vst.msk [vmem:[%s800_s4 + $0x2c] sm:$0xf] %vm434_vm2, %v518_v15  ;;  %v342_v22 = vadd.f32 %v698_v30, %v319_v16  ;;  %v350_v23 = vadd.f32 %v698_v30, %v327_v17  ;;  %v320_v24 = vmul.f32 %v693_v28, %v264_v20  ;;  %v266_v26 = vpop.f32.mrb[11].mxu0  ;;  %v298_v27 = vpop.f32.mrb[11].mxu1 }
 0x110   :  { %v328_v25 = vmul.f32 %v693_v28, %v296_v21 }
 0x111   :  { %v358_v29 = vmax.f32 %v342_v22, 0.0  ;;  %v366_v31 = vmax.f32 %v350_v23, 0.0  ;;  %v343_v32 = vadd.f32 %v698_v30, %v320_v24 }
 0x112   :  { %v351_v33 = vadd.f32 %v698_v30, %v328_v25 }
 0x113   :  { %v511_v34 = vpack.c.bf16 %v358_v29, %v358_v29  ;;  %v519_v35 = vpack.c.bf16 %v366_v31, %v366_v31  ;;  %v359_v36 = vmax.f32 %v343_v32, 0.0 }
 0x114   :  { %v367_v37 = vmax.f32 %v351_v33, 0.0  ;;  %v269_v38 = vpop.f32.mrb[12].mxu0  ;;  %v301_v39 = vpop.f32.mrb[12].mxu1 }
 0x115   :  { %439 = vst.msk [vmem:[%s800_s4 + $0x10] sm:$0xf] %vm434_vm2, %v511_v34  ;;  %447 = vst.msk [vmem:[%s800_s4 + $0x30] sm:$0xf] %vm434_vm2, %v519_v35  ;;  %v512_v40 = vpack.c.bf16 %v359_v36, %v359_v36  ;;  %v321_v42 = vmul.f32 %v693_v28, %v269_v38  ;;  %v329_v43 = vmul.f32 %v693_v28, %v301_v39  ;;  %v271_v44 = vpop.f32.mrb[13].mxu0  ;;  %v303_v45 = vpop.f32.mrb[13].mxu1 }
 0x116   :  { %v520_v41 = vpack.c.bf16 %v367_v37, %v367_v37  ;;  %v272_v46 = vpop.f32.mrb[14].mxu0  ;;  %v304_v47 = vpop.f32.mrb[14].mxu1 }
 0x117   :  { %440 = vst.msk [vmem:[%s800_s4 + $0x14] sm:$0xf] %vm434_vm2, %v512_v40  ;;  %v344_v48 = vadd.f32 %v698_v30, %v321_v42  ;;  %v352_v49 = vadd.f32 %v698_v30, %v329_v43  ;;  %v322_v50 = vmul.f32 %v693_v28, %v272_v46  ;;  %v330_v51 = vmul.f32 %v693_v28, %v304_v47  ;;  %v274_v52 = vpop.f32.mrb[15].mxu0  ;;  %v306_v53 = vpop.f32.mrb[15].mxu1 }
 0x118   :  { %448 = vst.msk [vmem:[%s800_s4 + $0x34] sm:$0xf] %vm434_vm2, %v520_v41 }
 0x119   :  { %v360_v54 = vmax.f32 %v344_v48, 0.0  ;;  %v368_v55 = vmax.f32 %v352_v49, 0.0  ;;  %v345_v56 = vadd.f32 %v698_v30, %v322_v50  ;;  %v353_v57 = vadd.f32 %v698_v30, %v330_v51 }
 0x11b   :  { %v513_v58 = vpack.c.bf16 %v360_v54, %v360_v54  ;;  %v521_v59 = vpack.c.bf16 %v368_v55, %v368_v55  ;;  %v361_v60 = vmax.f32 %v345_v56, 0.0  ;;  %v369_v61 = vmax.f32 %v353_v57, 0.0 }
 0x11d   :  { %441 = vst.msk [vmem:[%s800_s4 + $0x18] sm:$0xf] %vm434_vm2, %v513_v58  ;;  %449 = vst.msk [vmem:[%s800_s4 + $0x38] sm:$0xf] %vm434_vm2, %v521_v59  ;;  %v514_v28 = vpack.c.bf16 %v361_v60, %v361_v60  ;;  %v522_v62 = vpack.c.bf16 %v369_v61, %v369_v61 }
 0x11f   :  { %442 = vst.msk [vmem:[%s800_s4 + $0x1c] sm:$0xf] %vm434_vm2, %v514_v28  ;;  %450 = vst.msk [vmem:[%s800_s4 + $0x3c] sm:$0xf] %vm434_vm2, %v522_v62 }

</bundles_post_ra>
